<compile_context>
chip_gen: v7x
topology: tpu7x:2x2x1
jax: 0.10.0
libtpu: 0.0.40
codegen_flags: <defaults>
</compile_context>

<pallas_src>
import functools

import jax
import jax.numpy as jnp
from jax import lax
from jax.experimental import pallas as pl
from jax.experimental.pallas import tpu as pltpu

# Padded points are placed "very far away" so they can never win a real min;
# (1e18)^2 * C stays finite in float32 (everything is f32 inside the kernel)
# and padded rows/lanes are masked before the in-kernel sum.
_PAD_VALUE = 1e18


def _round_up(x, m):
    return ((x + m - 1) // m) * m


def _chamfer_kernel(pred_ref, gt_ref, out_ref, min_p_ref, min_g_ref, *,
                    C, N, M, TN, TM, STRIP):
    """Grid = (B, n_i, n_j); the gt-tile axis (j) is innermost.

    pred_ref : (1, TN, C)  pred tile (points on sublanes), resident over j
    gt_ref   : (1, C, TM)  gt tile (points on lanes), streamed over j
    out_ref  : (1, 1, 1)   per-batch accumulator (resident across i and j)
    min_p_ref: (TN, 128)   lane-folded running min over gt tiles/strips
    min_g_ref: (n_j, TM)   per-gt-tile running column min across pred tiles
    """
    i = pl.program_id(1)
    j = pl.program_id(2)
    n_i = pl.num_programs(1)
    n_j = pl.num_programs(2)

    # Per-batch accumulator init (first grid step of this batch).
    @pl.when((i == 0) & (j == 0))
    def _():
        out_ref[...] = jnp.zeros_like(out_ref)

    # New pred tile -> reset its lane-folded running min.
    @pl.when(j == 0)
    def _():
        min_p_ref[...] = jnp.full(min_p_ref.shape, jnp.inf,
                                  dtype=min_p_ref.dtype)

    # First pred tile -> reset this gt tile's running column min.
    @pl.when(i == 0)
    def _():
        min_g_ref[pl.ds(j, 1), :] = jnp.full((1, TM), jnp.inf,
                                             dtype=jnp.float32)

    p = pred_ref[0]                                   # (TN, C) float32
    g = gt_ref[0]                                     # (C, TM) float32
    p_cols = [p[:, c:c + 1] for c in range(C)]        # (TN, 1) each

    n_strips = TM // STRIP
    n_fold = STRIP // 128
    for s in range(n_strips):                         # static lane strips
        lo = s * STRIP
        # Pairwise squared distances for this strip: pure-VPU outer differences.
        diff = p_cols[0] - g[0:1, lo:lo + STRIP]      # (TN, STRIP)
        d2 = diff * diff
        for c in range(1, C):
            diff = p_cols[c] - g[c:c + 1, lo:lo + STRIP]
            d2 = d2 + diff * diff

        # Pred side: fold lanes down to 128 with elementwise VPU mins, then one
        # small read-min-write of the (TN, 128) accumulator per strip.
        folded = d2[:, 0:128]
        for t in range(1, n_fold):
            folded = jnp.minimum(folded, d2[:, t * 128:(t + 1) * 128])
        min_p_ref[...] = jnp.minimum(min_p_ref[...], folded)

        # Gt side: sublane-reduce to (1, STRIP) and min into scratch row j.
        col_min = jnp.min(d2, axis=0, keepdims=True)  # (1, STRIP)
        cur = min_g_ref[pl.ds(j, 1), lo:lo + STRIP]
        min_g_ref[pl.ds(j, 1), lo:lo + STRIP] = jnp.minimum(cur, col_min)

    # Pred-side finalize: all gt tiles seen for this pred tile.  One cross-lane
    # reduce, TN sqrts on the EUP, padded rows masked, partial sum accumulated.
    @pl.when(j == n_j - 1)
    def _():
        mp = jnp.min(min_p_ref[...], axis=1, keepdims=True)             # (TN, 1)
        rows = i * TN + lax.broadcasted_iota(jnp.int32, (TN, 1), 0)
        vals = jnp.where(rows < N, jnp.sqrt(mp), 0.0)
        out_ref[0] = out_ref[0] + jnp.sum(vals, axis=0, keepdims=True)

    # Gt-side finalize: all pred tiles seen for this gt tile.
    @pl.when(i == n_i - 1)
    def _():
        mg = min_g_ref[pl.ds(j, 1), :]                                  # (1, TM)
        cols = j * TM + lax.broadcasted_iota(jnp.int32, (1, TM), 1)
        vals = jnp.where(cols < M, jnp.sqrt(mg), 0.0)
        out_ref[0] = out_ref[0] + jnp.sum(vals, axis=1, keepdims=True)


def chamfer_distance_loss(pred, gt, *, tile_n=512, tile_m=2048):
    """pred: (B, N, C), gt: (B, M, C) -> scalar float32 chamfer distance."""
    B, N, C = pred.shape
    Bg, M, Cg = gt.shape
    assert B == Bg and C == Cg

    # Sublane-aligned pred tiles, lane-aligned gt tiles (clamped to the data).
    TN = min(_round_up(tile_n, 8), _round_up(N, 8))
    TM = min(_round_up(tile_m, 128), _round_up(M, 128))
    N_pad = _round_up(N, TN)
    M_pad = _round_up(M, TM)
    n_i = N_pad // TN
    n_j = M_pad // TM
    strip = 128
    for s in (512, 256, 128):                         # largest strip dividing TM
        if TM % s == 0:
            strip = s
            break

    pred_f = jnp.pad(pred.astype(jnp.float32),
                     ((0, 0), (0, N_pad - N), (0, 0)),
                     constant_values=_PAD_VALUE)
    gt_f = jnp.pad(gt.astype(jnp.float32),
                   ((0, 0), (0, M_pad - M), (0, 0)),
                   constant_values=_PAD_VALUE)
    gt_t = jnp.transpose(gt_f, (0, 2, 1))             # (B, C, M_pad) lane-dense

    partial = pl.pallas_call(
        functools.partial(_chamfer_kernel, C=C, N=N, M=M, TN=TN, TM=TM,
                          STRIP=strip),
        out_shape=jax.ShapeDtypeStruct((B, 1, 1), jnp.float32),
        grid_spec=pltpu.PrefetchScalarGridSpec(
            num_scalar_prefetch=0,
            grid=(B, n_i, n_j),
            in_specs=[
                # pred tile resident across the gt-tile axis.
                pl.BlockSpec((1, TN, C), lambda b, i, j: (b, i, 0)),
                # gt tiles streamed along the innermost grid axis.
                pl.BlockSpec((1, C, TM), lambda b, i, j: (b, 0, j)),
            ],
            # Per-batch scalar accumulator, resident across i and j.
            out_specs=pl.BlockSpec((1, 1, 1), lambda b, i, j: (b, 0, 0)),
            scratch_shapes=[
                pltpu.VMEM((TN, 128), jnp.float32),   # lane-folded pred mins
                pltpu.VMEM((n_j, TM), jnp.float32),   # sublane-packed gt mins
            ],
        ),
        compiler_params=pltpu.CompilerParams(
            dimension_semantics=("parallel", "arbitrary", "arbitrary"),
            vmem_limit_bytes=32 * 1024 * 1024,
        ),
    )(pred_f, gt_t)

    return jnp.sum(partial)


def _chamfer_reference(pred, gt):
    """Pure-JAX reference mirroring the PyTorch code (correctness check)."""
    def cdist(a, b):
        diff = a[:, :, None, :] - b[:, None, :, :]          # (B, N, M, C)
        dist = jnp.sqrt(jnp.sum(diff * diff, axis=-1))       # (B, N, M)
        return jnp.sum(jnp.min(dist, axis=-1), axis=-1)      # (B,)
    return jnp.sum(cdist(pred, gt) + cdist(gt, pred))


if __name__ == "__main__":
    key = jax.random.PRNGKey(0)
    k1, k2 = jax.random.split(key)
    B, N, M, C = 2, 21, 150, 3                     # exercises padding on both sides
    pred = jax.random.normal(k1, (B, N, C), dtype=jnp.float32)
    gt = jax.random.normal(k2, (B, M, C), dtype=jnp.float32)

    ref = jax.block_until_ready(_chamfer_reference(pred, gt))

    # Default (large-tile) path: single pred/gt tile per batch at these sizes.
    out = jax.block_until_ready(chamfer_distance_loss(pred, gt))
    assert jnp.allclose(out, ref, rtol=1e-4, atol=1e-4), (out, ref)

    # Small tiles: exercises multi-tile running-min paths, dynamic scratch-row
    # indexing, masking, and the per-batch accumulation across many steps.
    out_tiled = jax.block_until_ready(
        chamfer_distance_loss(pred, gt, tile_n=8, tile_m=128))
    assert jnp.allclose(out_tiled, ref, rtol=1e-4, atol=1e-4), (out_tiled, ref)

    print("KERNEL_OK")
</pallas_src>

<mosaic_0001>
module attributes {stable_mosaic.version = 11 : i64} {
  func.func @_chamfer_kernel(%arg0: i32, %arg1: i32, %arg2: i32, %arg3: memref<1x24x3xf32, #tpu.memory_space<vmem>>, %arg4: memref<1x3x256xf32, #tpu.memory_space<vmem>>, %arg5: memref<1x1x1xf32, #tpu.memory_space<vmem>>, %arg6: memref<24x128xf32, #tpu.memory_space<vmem>>, %arg7: memref<1x256xf32, #tpu.memory_space<vmem>>) attributes {dimension_semantics = [#tpu.dimension_semantics<parallel>, #tpu.dimension_semantics<arbitrary>, #tpu.dimension_semantics<arbitrary>], iteration_bounds = array<i64: 2, 1, 1>, scalar_prefetch = 0 : i64, scratch_operands = 2 : i64, tpu.core_type = #tpu.core_type<tc>, window_params = [{transform_indices = @transform_0, window_bounds = array<i64: 1, 24, 3>}, {transform_indices = @transform_1, window_bounds = array<i64: 1, 3, 256>}, {transform_indices = @transform_2, window_bounds = array<i64: 1, 1, 1>}]} {
    %c0_i32 = arith.constant 0 : i32
    %0 = arith.cmpi eq, %arg1, %c0_i32 : i32
    %c0_i32_0 = arith.constant 0 : i32
    %1 = arith.cmpi eq, %arg2, %c0_i32_0 : i32
    %2 = arith.andi %0, %1 : i1
    %3 = arith.extui %2 : i1 to i32
    %c0_i32_1 = arith.constant 0 : i32
    %4 = arith.cmpi ne, %3, %c0_i32_1 : i32
    scf.if %4 {
      %cst_21 = arith.constant 0.000000e+00 : f32
      %54 = vector.broadcast %cst_21 : f32 to vector<1x1x1xf32>
      %c0_22 = arith.constant 0 : index
      %c0_23 = arith.constant 0 : index
      %c0_24 = arith.constant 0 : index
      %55 = vector.load %arg5[%c0_22, %c0_23, %c0_24] : memref<1x1x1xf32, #tpu.memory_space<vmem>>, vector<1x1x1xf32>
      tpu.vector_store %arg5[%c0_22, %c0_23, %c0_24], %54 {strides = array<i32>} : memref<1x1x1xf32, #tpu.memory_space<vmem>>, vector<1x1x1xf32>,
    } else {
    }
    %c0_i32_2 = arith.constant 0 : i32
    %5 = arith.cmpi eq, %arg2, %c0_i32_2 : i32
    %6 = arith.extui %5 : i1 to i32
    %c0_i32_3 = arith.constant 0 : i32
    %7 = arith.cmpi ne, %6, %c0_i32_3 : i32
    scf.if %7 {
      %cst_21 = arith.constant 0x7F800000 : f32
      %54 = vector.broadcast %cst_21 : f32 to vector<24x128xf32>
      %c0_22 = arith.constant 0 : index
      %c0_23 = arith.constant 0 : index
      %55 = vector.load %arg6[%c0_22, %c0_23] : memref<24x128xf32, #tpu.memory_space<vmem>>, vector<24x128xf32>
      tpu.vector_store %arg6[%c0_22, %c0_23], %54 {strides = array<i32>} : memref<24x128xf32, #tpu.memory_space<vmem>>, vector<24x128xf32>,
    } else {
    }
    %c0_i32_4 = arith.constant 0 : i32
    %8 = arith.cmpi eq, %arg1, %c0_i32_4 : i32
    %9 = arith.extui %8 : i1 to i32
    %c0_i32_5 = arith.constant 0 : i32
    %10 = arith.cmpi ne, %9, %c0_i32_5 : i32
    scf.if %10 {
      %cst_21 = arith.constant 0x7F800000 : f32
      %54 = vector.broadcast %cst_21 : f32 to vector<1x256xf32>
      %55 = arith.index_cast %arg2 : i32 to index
      %c0_22 = arith.constant 0 : index
      %56 = vector.load %arg7[%55, %c0_22] : memref<1x256xf32, #tpu.memory_space<vmem>>, vector<1x256xf32>
      tpu.vector_store %arg7[%55, %c0_22], %54 {strides = array<i32>} : memref<1x256xf32, #tpu.memory_space<vmem>>, vector<1x256xf32>,
    } else {
    }
    %c0 = arith.constant 0 : index
    %c0_6 = arith.constant 0 : index
    %c0_7 = arith.constant 0 : index
    %11 = vector.load %arg3[%c0, %c0_6, %c0_7] : memref<1x24x3xf32, #tpu.memory_space<vmem>>, vector<1x24x3xf32>
    %12 = vector.shape_cast %11 : vector<1x24x3xf32> to vector<24x3xf32>
    %c0_8 = arith.constant 0 : index
    %c0_9 = arith.constant 0 : index
    %c0_10 = arith.constant 0 : index
    %13 = vector.load %arg4[%c0_8, %c0_9, %c0_10] : memref<1x3x256xf32, #tpu.memory_space<vmem>>, vector<1x3x256xf32>
    %14 = vector.shape_cast %13 : vector<1x3x256xf32> to vector<3x256xf32>
    %15 = vector.extract_strided_slice %12 {offsets = [0, 0], sizes = [24, 1], strides = [1, 1]} : vector<24x3xf32> to vector<24x1xf32>
    %16 = vector.extract_strided_slice %12 {offsets = [0, 1], sizes = [24, 1], strides = [1, 1]} : vector<24x3xf32> to vector<24x1xf32>
    %17 = vector.extract_strided_slice %12 {offsets = [0, 2], sizes = [24, 1], strides = [1, 1]} : vector<24x3xf32> to vector<24x1xf32>
    %18 = vector.extract_strided_slice %14 {offsets = [0, 0], sizes = [1, 256], strides = [1, 1]} : vector<3x256xf32> to vector<1x256xf32>
    %19 = vector.broadcast %15 : vector<24x1xf32> to vector<24x256xf32>
    %20 = vector.broadcast %18 : vector<1x256xf32> to vector<24x256xf32>
    %21 = arith.subf %19, %20 : vector<24x256xf32>
    %22 = arith.mulf %21, %21 : vector<24x256xf32>
    %23 = vector.extract_strided_slice %14 {offsets = [1, 0], sizes = [1, 256], strides = [1, 1]} : vector<3x256xf32> to vector<1x256xf32>
    %24 = vector.broadcast %16 : vector<24x1xf32> to vector<24x256xf32>
    %25 = vector.broadcast %23 : vector<1x256xf32> to vector<24x256xf32>
    %26 = arith.subf %24, %25 : vector<24x256xf32>
    %27 = arith.mulf %26, %26 : vector<24x256xf32>
    %28 = arith.addf %22, %27 : vector<24x256xf32>
    %29 = vector.extract_strided_slice %14 {offsets = [2, 0], sizes = [1, 256], strides = [1, 1]} : vector<3x256xf32> to vector<1x256xf32>
    %30 = vector.broadcast %17 : vector<24x1xf32> to vector<24x256xf32>
    %31 = vector.broadcast %29 : vector<1x256xf32> to vector<24x256xf32>
    %32 = arith.subf %30, %31 : vector<24x256xf32>
    %33 = arith.mulf %32, %32 : vector<24x256xf32>
    %34 = arith.addf %28, %33 : vector<24x256xf32>
    %35 = vector.extract_strided_slice %34 {offsets = [0, 0], sizes = [24, 128], strides = [1, 1]} : vector<24x256xf32> to vector<24x128xf32>
    %36 = vector.extract_strided_slice %34 {offsets = [0, 128], sizes = [24, 128], strides = [1, 1]} : vector<24x256xf32> to vector<24x128xf32>
    %37 = arith.minimumf %35, %36 : vector<24x128xf32>
    %c0_11 = arith.constant 0 : index
    %c0_12 = arith.constant 0 : index
    %38 = vector.load %arg6[%c0_11, %c0_12] : memref<24x128xf32, #tpu.memory_space<vmem>>, vector<24x128xf32>
    %39 = arith.minimumf %38, %37 : vector<24x128xf32>
    %c0_13 = arith.constant 0 : index
    %c0_14 = arith.constant 0 : index
    %40 = vector.load %arg6[%c0_13, %c0_14] : memref<24x128xf32, #tpu.memory_space<vmem>>, vector<24x128xf32>
    tpu.vector_store %arg6[%c0_13, %c0_14], %39 {strides = array<i32>} : memref<24x128xf32, #tpu.memory_space<vmem>>, vector<24x128xf32>,
    %cst = arith.constant dense<0x7F800000> : vector<256xf32>
    %41 = vector.multi_reduction <minimumf>, %34, %cst [0] : vector<24x256xf32> to vector<256xf32>
    %42 = vector.shape_cast %41 : vector<256xf32> to vector<1x256xf32>
    %43 = arith.index_cast %arg2 : i32 to index
    %c0_15 = arith.constant 0 : index
    %44 = vector.load %arg7[%43, %c0_15] : memref<1x256xf32, #tpu.memory_space<vmem>>, vector<1x256xf32>
    %45 = arith.minimumf %44, %42 : vector<1x256xf32>
    %46 = arith.index_cast %arg2 : i32 to index
    %c0_16 = arith.constant 0 : index
    %47 = vector.load %arg7[%46, %c0_16] : memref<1x256xf32, #tpu.memory_space<vmem>>, vector<1x256xf32>
    tpu.vector_store %arg7[%46, %c0_16], %45 {strides = array<i32>} : memref<1x256xf32, #tpu.memory_space<vmem>>, vector<1x256xf32>,
    %c0_i32_17 = arith.constant 0 : i32
    %48 = arith.cmpi eq, %arg2, %c0_i32_17 : i32
    %49 = arith.extui %48 : i1 to i32
    %c0_i32_18 = arith.constant 0 : i32
    %50 = arith.cmpi ne, %49, %c0_i32_18 : i32
    scf.if %50 {
      %c0_21 = arith.constant 0 : index
      %c0_22 = arith.constant 0 : index
      %54 = vector.load %arg6[%c0_21, %c0_22] : memref<24x128xf32, #tpu.memory_space<vmem>>, vector<24x128xf32>
      %cst_23 = arith.constant dense<0x7F800000> : vector<24xf32>
      %55 = vector.multi_reduction <minimumf>, %54, %cst_23 [1] : vector<24x128xf32> to vector<24xf32>
      %56 = vector.shape_cast %55 : vector<24xf32> to vector<24x1xf32>
      %c24_i32 = arith.constant 24 : i32
      %57 = arith.muli %arg1, %c24_i32 : i32
      %58 = tpu.iota {dimensions = array<i32: 0>} : vector<24x1xi32>
      %59 = vector.broadcast %57 : i32 to vector<24x1xi32>
      %60 = arith.addi %59, %58 : vector<24x1xi32>
      %c21_i32 = arith.constant 21 : i32
      %61 = vector.broadcast %c21_i32 : i32 to vector<24x1xi32>
      %62 = arith.cmpi slt, %60, %61 : vector<24x1xi32>
      %63 = math.sqrt %56 : vector<24x1xf32>
      %cst_24 = arith.constant 0.000000e+00 : f32
      %64 = vector.broadcast %cst_24 : f32 to vector<24x1xf32>
      %65 = arith.select %62, %63, %64 : vector<24x1xi1>, vector<24x1xf32>
      %c0_25 = arith.constant 0 : index
      %c0_26 = arith.constant 0 : index
      %c0_27 = arith.constant 0 : index
      %66 = vector.load %arg5[%c0_25, %c0_26, %c0_27] : memref<1x1x1xf32, #tpu.memory_space<vmem>>, vector<1x1x1xf32>
      %67 = vector.shape_cast %66 : vector<1x1x1xf32> to vector<1x1xf32>
      %cst_28 = arith.constant dense<0.000000e+00> : vector<1xf32>
      %68 = vector.multi_reduction <add>, %65, %cst_28 [0] : vector<24x1xf32> to vector<1xf32>
      %69 = vector.shape_cast %68 : vector<1xf32> to vector<1x1xf32>
      %70 = arith.addf %67, %69 : vector<1x1xf32>
      %c0_29 = arith.constant 0 : index
      %c0_30 = arith.constant 0 : index
      %c0_31 = arith.constant 0 : index
      %71 = vector.load %arg5[%c0_29, %c0_30, %c0_31] : memref<1x1x1xf32, #tpu.memory_space<vmem>>, vector<1x1x1xf32>
      %72 = vector.shape_cast %71 : vector<1x1x1xf32> to vector<1x1xf32>
      %73 = vector.shape_cast %70 : vector<1x1xf32> to vector<1x1x1xf32>
      tpu.vector_store %arg5[%c0_29, %c0_30, %c0_31], %73 {strides = array<i32>} : memref<1x1x1xf32, #tpu.memory_space<vmem>>, vector<1x1x1xf32>,
    } else {
    }
    %c0_i32_19 = arith.constant 0 : i32
    %51 = arith.cmpi eq, %arg1, %c0_i32_19 : i32
    %52 = arith.extui %51 : i1 to i32
    %c0_i32_20 = arith.constant 0 : i32
    %53 = arith.cmpi ne, %52, %c0_i32_20 : i32
    scf.if %53 {
      %54 = arith.index_cast %arg2 : i32 to index
      %c0_21 = arith.constant 0 : index
      %55 = vector.load %arg7[%54, %c0_21] : memref<1x256xf32, #tpu.memory_space<vmem>>, vector<1x256xf32>
      %c256_i32 = arith.constant 256 : i32
      %56 = arith.muli %arg2, %c256_i32 : i32
      %57 = tpu.iota {dimensions = array<i32: 1>} : vector<1x256xi32>
      %58 = vector.broadcast %56 : i32 to vector<1x256xi32>
      %59 = arith.addi %58, %57 : vector<1x256xi32>
      %c150_i32 = arith.constant 150 : i32
      %60 = vector.broadcast %c150_i32 : i32 to vector<1x256xi32>
      %61 = arith.cmpi slt, %59, %60 : vector<1x256xi32>
      %62 = math.sqrt %55 : vector<1x256xf32>
      %cst_22 = arith.constant 0.000000e+00 : f32
      %63 = vector.broadcast %cst_22 : f32 to vector<1x256xf32>
      %64 = arith.select %61, %62, %63 : vector<1x256xi1>, vector<1x256xf32>
      %c0_23 = arith.constant 0 : index
      %c0_24 = arith.constant 0 : index
      %c0_25 = arith.constant 0 : index
      %65 = vector.load %arg5[%c0_23, %c0_24, %c0_25] : memref<1x1x1xf32, #tpu.memory_space<vmem>>, vector<1x1x1xf32>
      %66 = vector.shape_cast %65 : vector<1x1x1xf32> to vector<1x1xf32>
      %cst_26 = arith.constant dense<0.000000e+00> : vector<1xf32>
      %67 = vector.multi_reduction <add>, %64, %cst_26 [1] : vector<1x256xf32> to vector<1xf32>
      %68 = vector.shape_cast %67 : vector<1xf32> to vector<1x1xf32>
      %69 = arith.addf %66, %68 : vector<1x1xf32>
      %c0_27 = arith.constant 0 : index
      %c0_28 = arith.constant 0 : index
      %c0_29 = arith.constant 0 : index
      %70 = vector.load %arg5[%c0_27, %c0_28, %c0_29] : memref<1x1x1xf32, #tpu.memory_space<vmem>>, vector<1x1x1xf32>
      %71 = vector.shape_cast %70 : vector<1x1x1xf32> to vector<1x1xf32>
      %72 = vector.shape_cast %69 : vector<1x1xf32> to vector<1x1x1xf32>
      tpu.vector_store %arg5[%c0_27, %c0_28, %c0_29], %72 {strides = array<i32>} : memref<1x1x1xf32, #tpu.memory_space<vmem>>, vector<1x1x1xf32>,
    } else {
    }
    return
  }
  func.func @transform_0(%arg0: i32, %arg1: i32, %arg2: i32) -> (i32, i32, i32) {
    %c0_i32 = arith.constant 0 : i32
    %c0_i32_0 = arith.constant 0 : i32
    return %arg0, %arg1, %c0_i32 : i32, i32, i32
  }
  func.func @transform_1(%arg0: i32, %arg1: i32, %arg2: i32) -> (i32, i32, i32) {
    %c0_i32 = arith.constant 0 : i32
    %c0_i32_0 = arith.constant 0 : i32
    return %arg0, %c0_i32, %arg2 : i32, i32, i32
  }
  func.func @transform_2(%arg0: i32, %arg1: i32, %arg2: i32) -> (i32, i32, i32) {
    %c0_i32 = arith.constant 0 : i32
    %c0_i32_0 = arith.constant 0 : i32
    %c0_i32_1 = arith.constant 0 : i32
    return %arg0, %c0_i32, %c0_i32_0 : i32, i32, i32
  }
}

</mosaic_0001>

<bundles_post_ra>
// kernel: tpu_custom_call.1
= control target key start
LH: loop header
LB: loop body
LE: loop exit
PB: predicated region body
PF: predicated region fallthrough
CT: control target
= control target key end

     0   :  { %s724_s9 = smov 0   ;;  %s726_s10 = smov 0   ;;  %s808_s0 = inlined_call_operand.vmem [shape: f32[2,24,3], index: 0, kind: input, shape index: {}]   ;;  %s809_s1 = inlined_call_operand.vmem [shape: f32[2,3,256], index: 1, kind: input, shape index: {}]   ;;  %s810_s2 = inlined_call_operand.vmem [shape: f32[2,1,1], index: 2, kind: output, shape index: {}]  }
   0x1   :  { %s728_s11 = smov 0  }
   0x2 LB: > { %s31_s12 = sadd.s32 1, %s697_s10  ;;  %p629_p0 = scmp.ge.s32.totalorder %s701_s11, 1  ;;  %s701_s11 = sphi %s728_s11, %s12_s11   ;;  %s697_s10 = sphi %s726_s10, %s814_s10   ;;  %s693_s9 = sphi %s724_s9, %s813_s9  }
   0x3   : > { %p33_p1 = scmp.ge.s32.totalorder %s31_s12, 2  ;;  %p155_p2 = scmp.lt.s32.totalorder %s701_s11, 3 }
   0x5   : > { %s816_s12 = smov (%p33_p1, %s31_s12), 0  ;;  %p156_p3 = pnand %p629_p0, %p155_p2 }
   0x6   : > { %p189_p4 = scmp.lt.s32.totalorder (!%p156_p3), %s693_s9, 1  ;;  %v703_v0 = vmov (!%p156_p3), 1   ;;  %v704_v1 = vmov (!%p156_p3), 0   ;;  %v705_v5 = vmov (!%p156_p3), 2   ;;  %v230_v6 = vlaneseq (!%p156_p3) }
   0x7   : > { %159 = sbr.rel (%p156_p3) target bundleno = 366 (0x16e), region = 28  ;;  %668 = vset.pattern.permute.xlu1 (!%p156_p3), %v703_v0  ;;  %667 = vset.pattern.permute.xlu0 (!%p156_p3), %v704_v1  ;;  %v706_v8 = vmov (!%p156_p3), inf   ;;  %vm217_vm1 = vcmask (!%p156_p3), 0   ;;  %vm530_vm5 = vcmask (!%p156_p3), 1040384  }
   0x8   : > { %vm749_vm0 = vcmp.lt.s32.totalorder (!%p156_p3), %v230_v6, 256  ;;  %v757_v9 = vshrl.u32 (!%p156_p3), %v230_v6, 7 }
   0x9   : > { %234 = vst.msk [vmem:[#allocation3] sm:$0x3] (!%p156_p3), %vm749_vm0, %v706_v8 }
   0xa   : > { %v763_v10 = vsub.s32 (!%p156_p3), 1, %v757_v9  ;;  %v303_v11 = vsub.s32 (!%p156_p3), 5, %v757_v9  ;;  %v767_v12 = vsub.s32 (!%p156_p3), 0, %v757_v9  ;;  %v261_v13 = vsub.s32 (!%p156_p3), 4, %v757_v9 }
   0xb   : > { %v347_v25 = vsub.s32 (!%p156_p3), 2, %v757_v9  ;;  %v351_v26 = vsub.s32 (!%p156_p3), 6, %v757_v9 }
   0xe   : > { %s818_s9 = smov (!%p189_p4, %s693_s9), 1 }
   0xf   : > { %s636_s13 = smul.u32 24, %s818_s9  ;;  %s635_s17 = sshll.u32 %s818_s9, 3 }
  0x10   : > { %s206_s20 = scalar_lea.vmem %s809_s1, %s635_s17  ;;  %s786_s23 = scalar_lea.vmem %s810_s2, %s818_s9 }
  0x11   : > { %s196_s16 = scalar_lea.vmem %s808_s0, %s636_s13  ;;  %v238_v14 = vld [vmem:[%s206_s20] sm:$0x77] }
  0x12   : > { %v235_v2 = vld [vmem:[%s196_s16] sm:$0xff]  ;;  %v237_v3 = vld [vmem:[%s196_s16 + $0x10] sm:$0xff]  ;;  %v236_v4 = vld [vmem:[%s196_s16 + $0x8] sm:$0xff]  ;;  %v300_v15 = vrot.slane %v238_v14, %v763_v10  ;;  %v304_v16 = vrot.slane %v238_v14, %v303_v11  ;;  %v258_v17 = vrot.slane %v238_v14, %v767_v12  ;;  %v262_v18 = vrot.slane %v238_v14, %v261_v13 }
  0x13   : > { %286 = vperm.xlu1 %668, %v235_v2   ;;  %241 = vperm.xlu0 %667, %v235_v2   ;;  %v348_v33 = vrot.slane %v238_v14, %v347_v25  ;;  %v352_v34 = vrot.slane %v238_v14, %v351_v26 }
  0x14   : > { %v310_v19 = vrot.slane %v300_v15, %v763_v10  ;;  %v314_v20 = vrot.slane %v304_v16, %v763_v10  ;;  %v268_v22 = vrot.slane %v258_v17, %v767_v12  ;;  %v272_v23 = vrot.slane %v262_v18, %v767_v12 }
  0x15   : > { %v358_v45 = vrot.slane %v348_v33, %v347_v25  ;;  %v362_v46 = vrot.slane %v352_v34, %v347_v25 }
  0x17   : > { %294 = vperm.xlu1 %668, %v237_v3   ;;  %251 = vperm.xlu0 %667, %v237_v3  }
  0x1b   : > { %290 = vperm.xlu1 %668, %v236_v4   ;;  %246 = vperm.xlu0 %667, %v236_v4  }
  0x1f   : > { %670 = vset.pattern.permute.xlu1 %v705_v5  ;;  %669 = vset.pattern.permute.xlu0 %v705_v5 }
  0x20   : > { %342 = vperm.xlu1 %670, %v237_v3   ;;  %334 = vperm.xlu0 %669, %v235_v2  }
  0x24   : > { %338 = vperm.xlu1 %670, %v236_v4  }
  0x92   : > { %v287_v21 = vpop.permute.xlu1 %286  ;;  %v242_v24 = vpop.permute.xlu0 %241 }
  0x93   : > { %v315_v27 = vsub.f32 %v287_v21, %v310_v19  ;;  %v316_v28 = vsub.f32 %v287_v21, %v314_v20  ;;  %v273_v29 = vsub.f32 %v242_v24, %v268_v22  ;;  %v274_v30 = vsub.f32 %v242_v24, %v272_v23 }
  0x95   : > { %v321_v35 = vmul.f32 %v315_v27, %v315_v27  ;;  %v322_v36 = vmul.f32 %v316_v28, %v316_v28  ;;  %v279_v37 = vmul.f32 %v273_v29, %v273_v29  ;;  %v280_v38 = vmul.f32 %v274_v30, %v274_v30 }
  0x96   : > { %v295_v31 = vpop.permute.xlu1 %294  ;;  %v252_v32 = vpop.permute.xlu0 %251 }
  0x97   : > { %v319_v41 = vsub.f32 %v295_v31, %v310_v19  ;;  %v320_v42 = vsub.f32 %v295_v31, %v314_v20  ;;  %v277_v43 = vsub.f32 %v252_v32, %v268_v22  ;;  %v278_v44 = vsub.f32 %v252_v32, %v272_v23 }
  0x98   : > { %v327_v51 = vadd.f32 %v321_v35, %v279_v37  ;;  %v328_v52 = vadd.f32 %v322_v36, %v280_v38  ;;  %v707_v38 = vmov 1966171168  }
  0x99   : > { %v325_v53 = vmul.f32 %v319_v41, %v319_v41  ;;  %v326_v54 = vmul.f32 %v320_v42, %v320_v42  ;;  %v283_v55 = vmul.f32 %v277_v43, %v277_v43  ;;  %v284_v56 = vmul.f32 %v278_v44, %v278_v44 }
  0x9a   : > { %v291_v39 = vpop.permute.xlu1 %290  ;;  %v247_v40 = vpop.permute.xlu0 %246 }
  0x9b   : > { %v317_v47 = vsub.f32 %v291_v39, %v310_v19  ;;  %v318_v48 = vsub.f32 %v291_v39, %v314_v20  ;;  %v275_v49 = vsub.f32 %v247_v40, %v268_v22  ;;  %v276_v50 = vsub.f32 %v247_v40, %v272_v23 }
  0x9c   : > { %v331_v11 = vadd.f32 %v325_v53, %v283_v55  ;;  %v332_v13 = vadd.f32 %v326_v54, %v284_v56  ;;  %v416_v39 = vunpack.c.l.s4 %v707_v38  ;;  %v502_v56 = vand.u32 127, %v230_v6 }
  0x9d   : > { %v323_v63 = vmul.f32 %v317_v47, %v317_v47  ;;  %v324_v0 = vmul.f32 %v318_v48, %v318_v48  ;;  %v281_v1 = vmul.f32 %v275_v49, %v275_v49  ;;  %v282_v2 = vmul.f32 %v276_v50, %v276_v50 }
  0x9e   : > { %v417_v44 = vunpack.c.0.s8 %v416_v39 }
  0x9f   : > { %v343_v57 = vpop.permute.xlu1 %342  ;;  %v335_v58 = vpop.permute.xlu0 %334  ;;  %v329_v19 = vadd.f32 %v323_v63, %v281_v1  ;;  %v330_v22 = vadd.f32 %v324_v0, %v282_v2 }
  0xa0   : > { %v367_v59 = vsub.f32 %v343_v57, %v358_v45  ;;  %v368_v60 = vsub.f32 %v343_v57, %v362_v46  ;;  %v363_v61 = vsub.f32 %v335_v58, %v358_v45  ;;  %v364_v62 = vsub.f32 %v335_v58, %v362_v46 }
  0xa1   : > { %v420_v49 = vsub.s32 %v417_v44, %v757_v9  ;;  %v503_v58 = vadd.s32 128, %v502_v56 }
  0xa2   : > { %v373_v3 = vmul.f32 %v367_v59, %v367_v59  ;;  %v374_v4 = vmul.f32 %v368_v60, %v368_v60  ;;  %v369_v5 = vmul.f32 %v363_v61, %v363_v61  ;;  %v370_v8 = vmul.f32 %v364_v62, %v364_v62 }
  0xa3   : > { %v339_v14 = vpop.permute.xlu1 %338  ;;  %v708_v59 = vmov 0.0   ;;  %vm508_vm4 = vcmp.lt.s32.totalorder %v503_v58, 150 }
  0xa4   : > { %v365_v15 = vsub.f32 %v339_v14, %v358_v45  ;;  %v366_v16 = vsub.f32 %v339_v14, %v362_v46  ;;  %v375_v17 = vadd.f32 %v369_v5, %v327_v51  ;;  %v376_v18 = vadd.f32 %v370_v8, %v328_v52  ;;  %v411_v52 = vld [vmem:[#allocation3] sm:$0x3]  ;;  %218 = vst.msk [vmem:[%s786_s23] sm:$0x1] %vm217_vm1, %v708_v59 }
  0xa5   : > { %v379_v20 = vadd.f32 %v373_v3, %v331_v11  ;;  %v380_v21 = vadd.f32 %v374_v4, %v332_v13  ;;  %v452_v14 = vadd.s32 16, %v757_v9 }
  0xa6   : > { %v371_v23 = vmul.f32 %v365_v15, %v365_v15  ;;  %v372_v24 = vmul.f32 %v366_v16, %v366_v16  ;;  %v381_v25 = vmin.f32 %v375_v17, %v376_v18 }
  0xa7   : > { %v393_v28 = vmin.f32 %v375_v17, %v379_v20  ;;  %v401_v29 = vmin.f32 %v376_v18, %v380_v21  ;;  %v383_v31 = vmin.f32 %v379_v20, %v380_v21  ;;  %vm459_vm8 = vcmp.lt.s32.totalorder %v452_v14, 21 }
  0xa8   : > { %442 = vmin.xlane.f32.xlu0 %v381_v25  ;;  %v377_v26 = vadd.f32 %v371_v23, %v329_v19  ;;  %v378_v27 = vadd.f32 %v372_v24, %v330_v22 }
  0xaa   : > { %v382_v30 = vmin.f32 %v377_v26, %v378_v27  ;;  %v394_v32 = vmin.f32 %v393_v28, %v377_v26  ;;  %v402_v33 = vmin.f32 %v401_v29, %v378_v27 }
  0xac   : > { %444 = vmin.xlane.f32.xlu1 %v382_v30  ;;  %v395_v34 = vrot.slane %v394_v32, 4  ;;  %v403_v35 = vrot.slane %v402_v33, 4  ;;  %446 = vmin.xlane.f32.xlu0 %v383_v31 }
  0xae   : > { %v396_v36 = vmin.f32 %v394_v32, %v395_v34  ;;  %v404_v37 = vmin.f32 %v402_v33, %v403_v35  ;;  %v484_v33 = vld [vmem:[%s786_s23] sm:$0x1] }
  0xb0   : > { %v397_v40 = vrot.slane %v396_v36, 2  ;;  %v405_v41 = vrot.slane %v404_v37, 2 }
  0xb2   : > { %v398_v42 = vmin.f32 %v396_v36, %v397_v40  ;;  %v406_v43 = vmin.f32 %v404_v37, %v405_v41 }
  0xb4   : > { %v399_v45 = vrot.slane %v398_v42, 1  ;;  %v407_v46 = vrot.slane %v406_v43, 1 }
  0xb6   : > { %v400_v47 = vmin.f32 %v398_v42, %v399_v45  ;;  %v408_v48 = vmin.f32 %v406_v43, %v407_v46 }
  0xb8   : > { %v414_v50 = vcombine.low %v400_v47, %v408_v48 }
  0xba   : > { %v421_v51 = vrot.slane %v414_v50, %v420_v49 }
  0xbc   : > { %v428_v53 = vrot.slane %v421_v51, %v420_v49 }
  0xbe   : > { %v430_v54 = vmin.f32 %v411_v52, %v428_v53 }
  0xc0   : > { %435 = vst.msk [vmem:[#allocation3] sm:$0x3] %vm749_vm0, %v430_v54 }
  0xc7   : > { %v499_v55 = vld [vmem:[#allocation3] sm:$0x3] }
  0xc8   : > { %671 = vrsqrt.f32 %v499_v55  ;;  %vm511_vm2 = vcmp.eq.f32.partialorder %v499_v55, inf  ;;  %v514_v7 = vand.u32 2147483648, %v499_v55  ;;  %vm513_vm3 = vcmp.eq.f32.partialorder %v499_v55, 0.0 }
  0xd2   : > { %v672_v57 = vpop.eup %671 }
  0xd3   : > { %v510_v60 = vmul.f32 %v672_v57, %v499_v55 }
  0xd5   : > { %v512_v61 = vsel %vm511_vm2, %v499_v55, %v510_v60 }
  0xd6   : > { %v515_v62 = vsel %vm513_vm3, %v514_v7, %v512_v61 }
  0xd7   : > { %v520_v6 = vrot.slane %v515_v62, %v767_v12  ;;  %v524_v63 = vrot.slane %v515_v62, %v763_v10 }
  0xd9   : > { %v528_v0 = vsel %vm508_vm4, %v524_v63, 0.0  ;;  %v531_v1 = vsel %vm530_vm5, %v520_v6, 0.0 }
  0xda   : > { %v532_v2 = vsel %vm530_vm5, %v528_v0, 0.0 }
  0xdb   : > { %v533_v3 = vadd.f32 %v532_v2, %v531_v1 }
  0xdd   : > { %534 = vadd.xlane.f32.xlu0 %v533_v3 }
 0x135   : > { %v443_v4 = vpop.xlane.xlu0 %442 }
 0x136   : > { %673 = vrsqrt.f32 %v443_v4  ;;  %vm462_vm6 = vcmp.eq.f32.partialorder %v443_v4, inf  ;;  %vm464_vm7 = vcmp.eq.f32.partialorder %v443_v4, 0.0  ;;  %v465_v17 = vand.u32 2147483648, %v443_v4 }
 0x139   : > { %v445_v5 = vpop.xlane.xlu1 %444  ;;  %v447_v8 = vpop.xlane.xlu0 %446 }
 0x13a   : > { %675 = vrsqrt.f32 %v445_v5  ;;  %vm469_vm9 = vcmp.eq.f32.partialorder %v445_v5, inf  ;;  %v472_v18 = vand.u32 2147483648, %v445_v5  ;;  %vm471_vm10 = vcmp.eq.f32.partialorder %v445_v5, 0.0 }
 0x13b   : > { %677 = vrsqrt.f32 %v447_v8  ;;  %vm476_vm11 = vcmp.eq.f32.partialorder %v447_v8, inf  ;;  %v479_v21 = vand.u32 2147483648, %v447_v8  ;;  %vm478_vm12 = vcmp.eq.f32.partialorder %v447_v8, 0.0 }
 0x140   : > { %v674_v11 = vpop.eup %673 }
 0x141   : > { %v461_v13 = vmul.f32 %v674_v11, %v443_v4 }
 0x143   : > { %v463_v16 = vsel %vm462_vm6, %v443_v4, %v461_v13 }
 0x144   : > { %v676_v15 = vpop.eup %675  ;;  %v466_v22 = vsel %vm464_vm7, %v465_v17, %v463_v16 }
 0x145   : > { %v678_v12 = vpop.eup %677  ;;  %v468_v10 = vmul.f32 %v676_v15, %v445_v5 }
 0x146   : > { %v475_v19 = vmul.f32 %v678_v12, %v447_v8 }
 0x147   : > { %v470_v20 = vsel %vm469_vm9, %v445_v5, %v468_v10 }
 0x148   : > { %v473_v23 = vsel %vm471_vm10, %v472_v18, %v470_v20  ;;  %v477_v9 = vsel %vm476_vm11, %v447_v8, %v475_v19 }
 0x149   : > { %v485_v24 = vadd.f32 %v473_v23, %v466_v22  ;;  %v480_v25 = vsel %vm478_vm12, %v479_v21, %v477_v9 }
 0x14a   : > { %v483_v26 = vsel %vm459_vm8, %v480_v25, 0.0 }
 0x14b   : > { %v486_v27 = vadd.f32 %v485_v24, %v483_v26 }
 0x14d   : > { %v487_v28 = vrot.slane %v486_v27, 4 }
 0x14f   : > { %v488_v29 = vadd.f32 %v487_v28, %v486_v27 }
 0x151   : > { %v489_v30 = vrot.slane %v488_v29, 2 }
 0x153   : > { %v490_v31 = vadd.f32 %v489_v30, %v488_v29 }
 0x155   : > { %v491_v32 = vrot.slane %v490_v31, 1 }
 0x157   : > { %v492_v34 = vadd.f32 %v491_v32, %v490_v31 }
 0x159   : > { %v493_v35 = vadd.f32 %v492_v34, %v484_v33 }
 0x15b   : > { %495 = vst.msk [vmem:[%s786_s23] sm:$0x1] %vm217_vm1, %v493_v35 }
 0x162   : > { %v529_v36 = vld [vmem:[%s786_s23] sm:$0x1] }
 0x16a   : > { %v535_v37 = vpop.xlane.xlu0 %534 }
 0x16b   : > { %v536_v38 = vadd.f32 %v535_v37, %v529_v36 }
 0x16d   : > { %538 = vst.msk [vmem:[%s786_s23] sm:$0x1] %vm217_vm1, %v536_v38 }
 0x16e PF: > { %s12_s11 = sadd.s32 1, %s701_s11   ;;  %s813_s9 = smov %s697_s10 }
 0x16f   : > { %p9_p5 = scmp.ge.s32.totalorder %s12_s11, 4   ;;  %s814_s10 = smov %s816_s12 }
 0x171   :  { %11 = sbr.rel (!%p9_p5) target bundleno = 2 (0x2), region = 83 }

</bundles_post_ra>
